<compile_context>
chip_gen: v7x
topology: tpu7x:2x2x1
jax: 0.10.0
libtpu: 0.0.40
codegen_flags: <defaults>
</compile_context>

<pallas_src>
import functools

import jax
import jax.numpy as jnp
from jax import lax
from jax.experimental import pallas as pl
from jax.experimental.pallas import tpu as pltpu


def _dice_kernel(x_ref, t_ref, out_ref, *, hw, tile_hw, mask_tail):
    j = pl.program_id(1)

    @pl.when(j == 0)
    def _():
        out_ref[...] = jnp.zeros_like(out_ref)

    x = x_ref[0].astype(jnp.float32)          # (C, TILE_HW) logits
    t = t_ref[0]                              # (1, TILE_HW) int32 labels

    # Numerically-stable softmax pieces; channel axis is the sublane axis.
    m = jnp.max(x, axis=0, keepdims=True)     # (1, TILE_HW)
    e = jnp.exp(x - m)                        # (C, TILE_HW)  -> EUP
    s = jnp.sum(e, axis=0, keepdims=True)     # (1, TILE_HW)  -> sublane reduce

    # One-hot selection of exp(x[label] - m) without building full softmax.
    c_iota = lax.broadcasted_iota(jnp.int32, x.shape, 0)
    num = jnp.sum(jnp.where(c_iota == t, e, 0.0), axis=0, keepdims=True)

    inter = num / s                           # per-pixel p[label], (1, TILE_HW)

    if mask_tail:
        col = j * tile_hw + lax.broadcasted_iota(jnp.int32, (1, tile_hw), 1)
        inter = jnp.where(col < hw, inter, 0.0)

    out_ref[0] += inter                       # lane-wide VPU accumulate (per batch)


def _pick_tile_hw(hw, c, itemsize, requested):
    if requested is not None:
        tile_hw = int(requested)
    else:
        # Target ~2 MiB of logits per block so DMA time dominates the
        # ~0.35 us per-grid-step overhead; keep lane count in a sane range.
        target_bytes = 2 * 1024 * 1024
        tile_hw = target_bytes // max(c * itemsize, 1)
        tile_hw = max(512, min(tile_hw, 65536))
    if hw <= tile_hw:
        return hw                              # block == full spatial dim
    return max(128, (tile_hw // 128) * 128)    # lane-aligned tile


def dice_loss_pallas(logits_nchw, targets_nhw, *, loss_weight=1.0,
                     eps=1e-5, tile_hw=None):
    N, C, H, W = logits_nchw.shape
    HW = H * W
    M = N * HW

    # Native-layout glue: no transpose, no dtype upcast in the wrapper.
    x = logits_nchw.reshape(N, C, HW)
    t = targets_nhw.reshape(N, 1, HW)
    if t.dtype != jnp.int32:
        t = t.astype(jnp.int32)

    itemsize = jnp.dtype(x.dtype).itemsize
    tile = _pick_tile_hw(HW, C, itemsize, tile_hw)
    grid_hw = pl.cdiv(HW, tile)
    mask_tail = (HW % tile) != 0

    kernel = functools.partial(_dice_kernel, hw=HW, tile_hw=tile,
                               mask_tail=mask_tail)

    partials = pl.pallas_call(
        kernel,
        out_shape=jax.ShapeDtypeStruct((N, 1, tile), jnp.float32),
        grid_spec=pltpu.PrefetchScalarGridSpec(
            num_scalar_prefetch=0,
            grid=(N, grid_hw),
            in_specs=[
                pl.BlockSpec((1, C, tile), lambda n, j: (n, 0, j)),
                pl.BlockSpec((1, 1, tile), lambda n, j: (n, 0, j)),
            ],
            # Output block resident across the spatial (reduction) axis.
            out_specs=pl.BlockSpec((1, 1, tile), lambda n, j: (n, 0, 0)),
        ),
        compiler_params=pltpu.CompilerParams(
            dimension_semantics=("parallel", "arbitrary")),
    )(x, t)

    # Tiny final reduction + scalar math (N * tile floats) done by XLA.
    intersection = jnp.sum(partials)
    # Analytic denominator: sum(softmax) == sum(one_hot) == N*H*W per pixel.
    dice = (2.0 * intersection + eps) / (2.0 * M + eps)
    return (loss_weight * (1.0 - dice)).astype(jnp.float32)


def dice_loss_reference(logits_nchw, targets_nhw, *, loss_weight=1.0, eps=1e-5):
    """Pure-JAX reference mirroring the PyTorch code (for verification)."""
    C = logits_nchw.shape[1]
    p = jax.nn.softmax(logits_nchw, axis=1)
    t = jnp.transpose(jax.nn.one_hot(targets_nhw, C, dtype=p.dtype), (0, 3, 1, 2))
    p = p.reshape(-1)
    t = t.reshape(-1)
    inter = jnp.sum(p * t)
    denom = jnp.sum(p) + jnp.sum(t)
    return loss_weight * (1.0 - (2.0 * inter + eps) / (denom + eps))


if __name__ == "__main__":
    key = jax.random.PRNGKey(0)
    k1, k2 = jax.random.split(key)

    # Small, even shape (single spatial tile per batch element).
    N, C, H, W = 2, 4, 16, 16
    logits = jax.random.normal(k1, (N, C, H, W), dtype=jnp.float32)
    targets = jax.random.randint(k2, (N, H, W), 0, C, dtype=jnp.int32)

    loss = dice_loss_pallas(logits, targets, loss_weight=1.0, eps=1e-5)
    loss = jax.block_until_ready(loss)
    ref = dice_loss_reference(logits, targets, loss_weight=1.0, eps=1e-5)
    assert jnp.allclose(loss, ref, atol=1e-5, rtol=1e-4), (loss, ref)

    # Non-divisible spatial size: exercises the cdiv grid + tail-mask path.
    H2, W2 = 16, 17
    logits2 = jax.random.normal(k1, (N, C, H2, W2), dtype=jnp.float32)
    targets2 = jax.random.randint(k2, (N, H2, W2), 0, C, dtype=jnp.int32)
    loss2 = jax.block_until_ready(
        dice_loss_pallas(logits2, targets2, loss_weight=1.0, eps=1e-5, tile_hw=128))
    ref2 = dice_loss_reference(logits2, targets2, loss_weight=1.0, eps=1e-5)
    assert jnp.allclose(loss2, ref2, atol=1e-5, rtol=1e-4), (loss2, ref2)

    # bf16 logits path (kernel casts in-VMEM, half the HBM traffic).
    logits3 = logits.astype(jnp.bfloat16)
    loss3 = jax.block_until_ready(dice_loss_pallas(logits3, targets))
    ref3 = dice_loss_reference(logits3.astype(jnp.float32), targets)
    assert jnp.allclose(loss3, ref3, atol=5e-3, rtol=5e-3), (loss3, ref3)

    print("KERNEL_OK")
</pallas_src>

<mosaic_0001>
module attributes {stable_mosaic.version = 11 : i64} {
  func.func @_dice_kernel(%arg0: i32, %arg1: i32, %arg2: memref<1x4x256xf32, #tpu.memory_space<vmem>>, %arg3: memref<1x1x256xi32, #tpu.memory_space<vmem>>, %arg4: memref<1x1x256xf32, #tpu.memory_space<vmem>>) attributes {dimension_semantics = [#tpu.dimension_semantics<parallel>, #tpu.dimension_semantics<arbitrary>], iteration_bounds = array<i64: 2, 1>, scalar_prefetch = 0 : i64, scratch_operands = 0 : i64, tpu.core_type = #tpu.core_type<tc>, window_params = [{transform_indices = @transform_0, window_bounds = array<i64: 1, 4, 256>}, {transform_indices = @transform_1, window_bounds = array<i64: 1, 1, 256>}, {transform_indices = @transform_2, window_bounds = array<i64: 1, 1, 256>}]} {
    %c0_i32 = arith.constant 0 : i32
    %0 = arith.cmpi eq, %arg1, %c0_i32 : i32
    %1 = arith.extui %0 : i1 to i32
    %c0_i32_0 = arith.constant 0 : i32
    %2 = arith.cmpi ne, %1, %c0_i32_0 : i32
    scf.if %2 {
      %cst_15 = arith.constant 0.000000e+00 : f32
      %28 = vector.broadcast %cst_15 : f32 to vector<1x1x256xf32>
      %c0_16 = arith.constant 0 : index
      %c0_17 = arith.constant 0 : index
      %c0_18 = arith.constant 0 : index
      %29 = vector.load %arg4[%c0_16, %c0_17, %c0_18] : memref<1x1x256xf32, #tpu.memory_space<vmem>>, vector<1x1x256xf32>
      tpu.vector_store %arg4[%c0_16, %c0_17, %c0_18], %28 {strides = array<i32>} : memref<1x1x256xf32, #tpu.memory_space<vmem>>, vector<1x1x256xf32>,
    } else {
    }
    %c0 = arith.constant 0 : index
    %c0_1 = arith.constant 0 : index
    %c0_2 = arith.constant 0 : index
    %3 = vector.load %arg2[%c0, %c0_1, %c0_2] : memref<1x4x256xf32, #tpu.memory_space<vmem>>, vector<1x4x256xf32>
    %4 = vector.shape_cast %3 : vector<1x4x256xf32> to vector<4x256xf32>
    %c0_3 = arith.constant 0 : index
    %c0_4 = arith.constant 0 : index
    %c0_5 = arith.constant 0 : index
    %5 = vector.load %arg3[%c0_3, %c0_4, %c0_5] : memref<1x1x256xi32, #tpu.memory_space<vmem>>, vector<1x1x256xi32>
    %6 = vector.shape_cast %5 : vector<1x1x256xi32> to vector<1x256xi32>
    %cst = arith.constant dense<0xFF800000> : vector<256xf32>
    %7 = vector.multi_reduction <maximumf>, %4, %cst [0] : vector<4x256xf32> to vector<256xf32>
    %8 = vector.shape_cast %7 : vector<256xf32> to vector<1x256xf32>
    %9 = vector.broadcast %8 : vector<1x256xf32> to vector<4x256xf32>
    %10 = arith.subf %4, %9 : vector<4x256xf32>
    %11 = math.exp %10 : vector<4x256xf32>
    %cst_6 = arith.constant dense<0.000000e+00> : vector<256xf32>
    %12 = vector.multi_reduction <add>, %11, %cst_6 [0] : vector<4x256xf32> to vector<256xf32>
    %13 = vector.shape_cast %12 : vector<256xf32> to vector<1x256xf32>
    %14 = tpu.iota {dimensions = array<i32: 0>} : vector<4x256xi32>
    %15 = vector.broadcast %6 : vector<1x256xi32> to vector<4x256xi32>
    %16 = arith.cmpi eq, %14, %15 : vector<4x256xi32>
    %cst_7 = arith.constant 0.000000e+00 : f32
    %17 = vector.broadcast %cst_7 : f32 to vector<4x256xf32>
    %18 = arith.select %16, %11, %17 : vector<4x256xi1>, vector<4x256xf32>
    %cst_8 = arith.constant dense<0.000000e+00> : vector<256xf32>
    %19 = vector.multi_reduction <add>, %18, %cst_8 [0] : vector<4x256xf32> to vector<256xf32>
    %20 = vector.shape_cast %19 : vector<256xf32> to vector<1x256xf32>
    %21 = arith.divf %20, %13 : vector<1x256xf32>
    %c0_9 = arith.constant 0 : index
    %c0_10 = arith.constant 0 : index
    %c0_11 = arith.constant 0 : index
    %22 = vector.load %arg4[%c0_9, %c0_10, %c0_11] : memref<1x1x256xf32, #tpu.memory_space<vmem>>, vector<1x1x256xf32>
    %23 = vector.shape_cast %22 : vector<1x1x256xf32> to vector<1x256xf32>
    %24 = arith.addf %23, %21 : vector<1x256xf32>
    %c0_12 = arith.constant 0 : index
    %c0_13 = arith.constant 0 : index
    %c0_14 = arith.constant 0 : index
    %25 = vector.load %arg4[%c0_12, %c0_13, %c0_14] : memref<1x1x256xf32, #tpu.memory_space<vmem>>, vector<1x1x256xf32>
    %26 = vector.shape_cast %25 : vector<1x1x256xf32> to vector<1x256xf32>
    %27 = vector.shape_cast %24 : vector<1x256xf32> to vector<1x1x256xf32>
    tpu.vector_store %arg4[%c0_12, %c0_13, %c0_14], %27 {strides = array<i32>} : memref<1x1x256xf32, #tpu.memory_space<vmem>>, vector<1x1x256xf32>,
    return
  }
  func.func @transform_0(%arg0: i32, %arg1: i32) -> (i32, i32, i32) {
    %c0_i32 = arith.constant 0 : i32
    %c0_i32_0 = arith.constant 0 : i32
    return %arg0, %c0_i32, %arg1 : i32, i32, i32
  }
  func.func @transform_1(%arg0: i32, %arg1: i32) -> (i32, i32, i32) {
    %c0_i32 = arith.constant 0 : i32
    %c0_i32_0 = arith.constant 0 : i32
    return %arg0, %c0_i32, %arg1 : i32, i32, i32
  }
  func.func @transform_2(%arg0: i32, %arg1: i32) -> (i32, i32, i32) {
    %c0_i32 = arith.constant 0 : i32
    %c0_i32_0 = arith.constant 0 : i32
    %c0_i32_1 = arith.constant 0 : i32
    return %arg0, %c0_i32, %c0_i32_0 : i32, i32, i32
  }
}

</mosaic_0001>

<bundles_post_ra>
// kernel: tpu_custom_call.1
= control target key start
LH: loop header
LB: loop body
LE: loop exit
PB: predicated region body
PF: predicated region fallthrough
CT: control target
= control target key end

     0   :  { %7 = vsyncpa [#allocation3], 0  ;;  %s956_s0 = inlined_call_operand.hbm [shape: f32[2,4,256], index: 0, kind: input, shape index: {}]   ;;  %s957_s1 = inlined_call_operand.hbm [shape: s32[2,1,256], index: 1, kind: input, shape index: {}]   ;;  %s958_s2 = inlined_call_operand.hbm [shape: f32[2,1,256], index: 2, kind: output, shape index: {}]  }
   0x1   :  { %9 = vsyncpa [#allocation3 + $0x1], 0 }
   0x2   :  { %10 = vsyncpa [#allocation6], 0 }
   0x3   :  { %12 = vsyncpa [#allocation6 + $0x1], 0 }
   0x4   :  { %13 = vsyncpa [#allocation4], 0 }
   0x5   :  { %15 = vsyncpa [#allocation4 + $0x1], 0  ;;  %s718_s9 = smov 0   ;;  %s720_s10 = smov 0  }
   0x6   :  { %s722_s11 = smov 0   ;;  %s724_s12 = smov 0  }
   0x7   :  { %s726_s13 = smov 0   ;;  %s728_s14 = smov 0  }
   0x8 LB: > { %s452_s15 = sadd.s32 4294967295, %s696_s14   ;;  %s453_s16 = sadd.s32 4294967294, %s696_s14   ;;  %s696_s14 = sphi %s728_s14, %s21_s14   ;;  %s692_s13 = sphi %s726_s13, %s980_s13   ;;  %s688_s12 = sphi %s724_s12, %s979_s12   ;;  %s684_s11 = sphi %s722_s11, %s978_s11   ;;  %s680_s10 = sphi %s720_s10, %s977_s10   ;;  %s676_s9 = sphi %s718_s9, %s976_s9  }
   0x9   : > { %s33_s17 = sadd.s32 1, %s692_s13  ;;  %s42_s18 = sadd.s32 1, %s684_s11 }
   0xa   : > { %p35_p0 = scmp.ge.s32.totalorder %s33_s17, 2  ;;  %p49_p1 = scmp.ne.s32.totalorder %s684_s11, %s680_s10 }
   0xb   : > { %p50_p2 = scmp.eq.s32.totalorder %s696_s14, 0  ;;  %p55_p3 = scmp.ne.s32.totalorder %s680_s10, %s676_s9 }
   0xc   : > { %s982_s17 = smov (%p35_p0, %s33_s17), 0  ;;  %p56_p5 = scmp.eq.s32.totalorder %s452_s15, 0 }
   0xd   : > { %p759_p4 = por %p50_p2, %p49_p1  ;;  %s37_s20 = ssub.s32 %s692_s13, %s982_s17 }
   0xe   : > { %p107_p6 = scmp.eq.s32.totalorder %s452_s15, 1  ;;  %p40_p7 = scmp.eq.s32.totalorder %s37_s20, 0 }
   0xf   : > { %p765_p8 = por %p56_p5, %p55_p3  ;;  %p113_p10 = scmp.eq.s32.totalorder %s453_s16, 1 }
  0x10   : > { %p769_p9 = por %p107_p6, %p49_p1  ;;  %p491_p13 = scmp.lt.s32.totalorder %s696_s14, 2 }
  0x11   : > { %s962_s21 = scalar_select %p765_p8, 1, 0 }
  0x12   : > { %s963_s22 = scalar_select %p769_p9, 1, 0 }
  0x13   : > { %s774_s23 = scalar_select %p40_p7, %s684_s11, %s42_s18  }
  0x14   : > { %p776_p11 = por %p113_p10, %p55_p3  ;;  %s783_s25 = sand.u32 1, %s684_s11  }
  0x15   : > { %s456_s26 = sshll.u32 %s783_s25, 3  ;;  %s471_s27 = sshll.u32 %s692_s13, 7 }
  0x16   : > { %s964_s24 = scalar_select %p776_p11, 1, 0 }
  0x17   : > { %s790_s30 = scalar_lea.hbm %s956_s0, %s471_s27  ;;  %s137_s3 = scalar_lea.vmem [#allocation2], %s456_s26 }
  0x18   : > { %s147_s4 = sshll.u32 %s137_s3, 4  ;;  %p796_p0 = pnand %p491_p13, %p759_p4  ;;  %s792_s4 = int_to_ptr.vmem [resolvable:$true] %s147_s4 }
  0x19   : > { %s134_s6 = scalar_lea.sflag [#allocation3], %s783_s25  ;;  %s550_s7 = scalar_lea.hbm %s790_s30, 128 }
  0x1a   : > { %p551_p3 = scmp.ne.s32.totalorder %s790_s30, %s550_s7  ;;  %p552_p5 = pneg %p796_p0 }
  0x1b   : > { %s555_s16 = scalar_lea.hbm %s956_s0, 256  ;;  %p556_p4 = scmp.lt.u32.totalorder %s790_s30, %s956_s0 }
  0x1c   : > { %p553_p6 = pnand %p552_p5, %p551_p3  ;;  %p557_p10 = scmp.lt.u32.totalorder %s555_s16, %s550_s7 }
  0x1d   : > { %p559_p12 = scmp.lt.u32.totalorder %s550_s7, %s790_s30 }
  0x1e   : > { %p554_p7 = pneg %p553_p6  ;;  %p558_p13 = por %p557_p10, %p556_p4 }
  0x20   : > { %p560_p1 = por %p559_p12, %p558_p13 }
  0x22   : > { %p561_p2 = pnand %p560_p1, %p554_p7 }
  0x24   : > { %564 = shalt.err (!%p561_p2)
}
  0x25   : > { %s565_s20 = scalar_lea.vmem %s792_s4, 128  ;;  %s698_s26 = smov [#allocation2]  }
  0x26   : > { %p566_p3 = scmp.ne.s32.totalorder %s792_s4, %s565_s20  ;;  %s570_s27 = sshll.u32 %s698_s26, 4  ;;  %s571_s27 = int_to_ptr.vmem [resolvable:$false] %s570_s27 }
  0x27   : > { %s572_s28 = scalar_lea.vmem %s571_s27, 256  ;;  %p573_p9 = scmp.lt.s32.totalorder %s792_s4, %s571_s27 }
  0x28   : > { %p568_p6 = pnand %p566_p3, %p552_p5  ;;  %p574_p4 = scmp.lt.s32.totalorder %s572_s28, %s565_s20 }
  0x2a   : > { %p569_p11 = pneg %p568_p6  ;;  %p575_p10 = por %p574_p4, %p573_p9 }
  0x2c   : > { %p576_p12 = pnand %p575_p10, %p569_p11 }
  0x2e   : > { %579 = shalt.err (!%p576_p12)
}
  0x2f   : > { %483 = dma.hbm_to_vmem [thread:$0]  (!%p796_p0), %s790_s30, 128, %s792_s4, %s134_s6  }
  0x30   : > { %p966_p1 = scmp.lt.s32.totalorder %s696_s14, 3  ;;  %p967_p2 = scmp.ge.s32.totalorder %s696_s14, 1 }
  0x31   : > { %s459_s3 = sshll.u32 %s783_s25, 1  ;;  %s472_s7 = sshll.u32 %s692_s13, 5 }
  0x32   : > { %p832_p7 = pnand %p967_p2, %p966_p1  ;;  %s841_s16 = scalar_lea.hbm %s957_s1, %s472_s7 }
  0x33   : > { %s158_s18 = scalar_lea.vmem [#allocation5], %s459_s3  ;;  %s155_s30 = scalar_lea.sflag [#allocation6], %s783_s25 }
  0x34   : > { %s968_s29 = scalar_select %p832_p7, 1, 0 }
  0x35   : > { %s168_s19 = sshll.u32 %s158_s18, 4  ;;  %s580_s4 = scalar_lea.hbm %s841_s16, 32  ;;  %s169_s19 = int_to_ptr.vmem [resolvable:$true] %s168_s19 }
  0x36   : > { %p581_p9 = scmp.ne.s32.totalorder %s841_s16, %s580_s4  ;;  %s585_s26 = scalar_lea.hbm %s957_s1, 64 }
  0x37   : > { %p586_p3 = scmp.lt.u32.totalorder %s841_s16, %s957_s1  ;;  %p587_p6 = scmp.lt.u32.totalorder %s585_s26, %s580_s4 }
  0x38   : > { %p583_p11 = pnand %p581_p9, %p552_p5  ;;  %p589_p10 = scmp.lt.u32.totalorder %s580_s4, %s841_s16 }
  0x39   : > { %p588_p4 = por %p587_p6, %p586_p3 }
  0x3a   : > { %p584_p13 = pneg %p583_p11 }
  0x3b   : > { %p590_p12 = por %p589_p10, %p588_p4 }
  0x3d   : > { %p591_p1 = pnand %p590_p12, %p584_p13 }
  0x3f   : > { %594 = shalt.err (!%p591_p1)
}
  0x40   : > { %s595_s25 = scalar_lea.vmem %s169_s19, 32  ;;  %s699_s3 = smov [#allocation5]  }
  0x41   : > { %p596_p2 = scmp.ne.s32.totalorder %s169_s19, %s595_s25  ;;  %s600_s7 = sshll.u32 %s699_s3, 4  ;;  %s601_s7 = int_to_ptr.vmem [resolvable:$false] %s600_s7 }
  0x42   : > { %s602_s8 = scalar_lea.vmem %s601_s7, 64  ;;  %p603_p8 = scmp.lt.s32.totalorder %s169_s19, %s601_s7 }
  0x43   : > { %p598_p9 = pnand %p596_p2, %p552_p5  ;;  %p604_p7 = scmp.lt.s32.totalorder %s602_s8, %s595_s25 }
  0x45   : > { %p599_p11 = pneg %p598_p9  ;;  %p605_p3 = por %p604_p7, %p603_p8 }
  0x47   : > { %p606_p6 = pnand %p605_p3, %p599_p11 }
  0x49   : > { %609 = shalt.err (!%p606_p6)
}
  0x4a   : > { %486 = dma.hbm_to_vmem [thread:$0]  (!%p796_p0), %s841_s16, 32, %s169_s19, %s155_s30  }
  0x4b   : > { %p969_p13 = scmp.ne.s32.totalorder %s968_s29, 0 }
  0x4c   : > { %s866_s15 = sand.u32 (!%p969_p13), 1, %s680_s10   ;;  %p970_p5 = scmp.ne.s32.totalorder (!%p969_p13), %s962_s21, 0 }
  0x4d   : > { %177 = sbr.rel (%p969_p13) target bundleno = 171 (0xab), region = 28  ;;  %s463_s18 = sshll.u32 (!%p969_p13), %s866_s15, 3 }
  0x4e   : > { %s180_s4 = scalar_lea.sflag (!%p969_p13), [#allocation3], %s866_s15  ;;  %s183_s6 = scalar_lea.vmem (!%p969_p13), [#allocation2], %s463_s18 }
  0x54   : > { %663 = dma.done.wait (%p970_p5), %s180_s4, 128  }
  0x55   : > { %665 = vsyncadd (%p970_p5), %s180_s4, 4294967168  ;;  %s464_s5 = sshll.u32 %s866_s15, 1  ;;  %s189_s29 = scalar_lea.sflag [#allocation6], %s866_s15 }
  0x56   : > { %s876_s16 = scalar_lea.vmem [#allocation5], %s464_s5 }
  0x57   : > { %667 = dma.done.wait (%p970_p5), %s189_s29, 32  }
  0x58   : > { %669 = vsyncadd (%p970_p5), %s189_s29, 4294967264  ;;  %v224_v0 = vlaneseq  ;;  %s886_s19 = scalar_lea.vmem [#allocation7], %s464_s5  ;;  %v700_v2 = vmov 0.0   ;;  %vm234_vm1 = vcmask 1043456   ;;  %v229_v3 = vld [vmem:[%s183_s6] sm:$0xff]  ;;  %s473_s21 = sshll.u32 %s688_s12, 5 }
  0x59   : > { %v232_v4 = vcombine.high %v229_v3, %v229_v3  ;;  %v235_v5 = vsel %vm234_vm1, %v229_v3, -inf  ;;  %v230_v24 = vld [vmem:[%s876_s16] sm:$0x3]  ;;  %v701_v58 = vmov 1966171168   ;;  %s345_s30 = sshll.u32 %s886_s19, 4  ;;  %s904_s27 = scalar_lea.hbm %s958_s2, %s473_s21  ;;  %s906_s30 = int_to_ptr.vmem [resolvable:$true] %s345_s30 }
  0x5a   : > { %vm882_vm0 = vcmp.lt.s32.totalorder %v224_v0, 256  ;;  %v236_v6 = vrot.slane %v235_v5, 4  ;;  %v274_v21 = vshrl.u32 %v224_v0, 7  ;;  %v310_v59 = vunpack.c.l.s4 %v701_v58  ;;  %s331_s28 = scalar_lea.sflag [#allocation4], %s866_s15  ;;  %s610_s25 = scalar_lea.vmem %s906_s30, 32 }
  0x5b   : > { %228 = vst.msk [vmem:[%s886_s19] sm:$0x3] %vm882_vm0, %v700_v2  ;;  %v242_v7 = vsel %vm234_vm1, %v232_v4, -inf  ;;  %p611_p8 = scmp.ne.s32.totalorder %s906_s30, %s610_s25  ;;  %p973_p0 = scmp.ne.s32.totalorder %s963_s22, 0 }
  0x5c   : > { %v237_v8 = vmax.f32 %v235_v5, %v236_v6  ;;  %v243_v9 = vrot.slane %v242_v7, 4  ;;  %v277_v23 = vsub.s32 0, %v274_v21  ;;  %v281_v25 = vsub.s32 1, %v274_v21  ;;  %s702_s12 = smov [#allocation7]  }
  0x5d   : > { %v311_v62 = vunpack.c.0.s8 %v310_v59  ;;  %p612_p7 = pnand %p611_p8, %p973_p0  ;;  %s614_s3 = sshll.u32 %s702_s12, 4  ;;  %s615_s3 = int_to_ptr.vmem [resolvable:$false] %s614_s3 }
  0x5e   : > { %v238_v10 = vrot.slane %v237_v8, 2  ;;  %v244_v11 = vmax.f32 %v242_v7, %v243_v9  ;;  %v278_v26 = vrot.slane %v230_v24, %v277_v23  ;;  %v282_v27 = vrot.slane %v230_v24, %v281_v25  ;;  %s616_s7 = scalar_lea.vmem %s615_s3, 64  ;;  %p617_p10 = scmp.lt.s32.totalorder %s906_s30, %s615_s3 }
  0x5f   : > { %v314_v4 = vsub.s32 %v311_v62, %v274_v21  ;;  %p613_p4 = pneg %p612_p7  ;;  %p618_p12 = scmp.lt.s32.totalorder %s616_s7, %s610_s25 }
  0x60   : > { %v239_v12 = vmax.f32 %v237_v8, %v238_v10  ;;  %v245_v13 = vrot.slane %v244_v11, 2  ;;  %vm283_vm2 = vcmp.eq.s32.totalorder %v274_v21, %v278_v26  ;;  %vm284_vm3 = vcmp.eq.s32.totalorder %v274_v21, %v282_v27 }
  0x61   : > { %p619_p1 = por %p618_p12, %p617_p10 }
  0x62   : > { %v240_v14 = vrot.slane %v239_v12, 1  ;;  %v246_v15 = vmax.f32 %v244_v11, %v245_v13  ;;  %v305_v7 = vld [vmem:[%s886_s19] sm:$0x3] }
  0x63   : > { %p620_p2 = pnand %p619_p1, %p613_p4 }
  0x64   : > { %v241_v16 = vmax.f32 %v239_v12, %v240_v14  ;;  %v247_v17 = vrot.slane %v246_v15, 1 }
  0x66   : > { %v248_v18 = vmax.f32 %v246_v15, %v247_v17 }
  0x68   : > { %v251_v19 = vcombine.low %v241_v16, %v248_v18 }
  0x6a   : > { %v253_v20 = vsub.f32 %v229_v3, %v251_v19 }
  0x6c   : > { %v254_v22 = vmul.f32 1.442695, %v253_v20 }
  0x6e   : > { %544 = vpow2.f32 %v254_v22 }
  0x78   : > { %v545_v28 = vpop.eup %544 }
  0x79   : > { %v257_v29 = vcombine.high %v545_v28, %v545_v28  ;;  %v259_v30 = vsel %vm234_vm1, %v545_v28, 0.0  ;;  %v285_v31 = vsel %vm283_vm2, %v545_v28, 0.0 }
  0x7a   : > { %v260_v32 = vrot.slane %v259_v30, 4  ;;  %v287_v33 = vsel %vm234_vm1, %v285_v31, 0.0 }
  0x7b   : > { %v266_v34 = vsel %vm234_vm1, %v257_v29, 0.0  ;;  %v286_v35 = vsel %vm284_vm3, %v257_v29, 0.0  ;;  %v288_v36 = vrot.slane %v287_v33, 4 }
  0x7c   : > { %v261_v37 = vadd.f32 %v260_v32, %v259_v30  ;;  %v267_v38 = vrot.slane %v266_v34, 4  ;;  %v294_v39 = vsel %vm234_vm1, %v286_v35, 0.0 }
  0x7d   : > { %v289_v40 = vadd.f32 %v288_v36, %v287_v33  ;;  %v295_v41 = vrot.slane %v294_v39, 4 }
  0x7e   : > { %v262_v42 = vrot.slane %v261_v37, 2  ;;  %v268_v43 = vadd.f32 %v267_v38, %v266_v34 }
  0x7f   : > { %v296_v44 = vadd.f32 %v295_v41, %v294_v39  ;;  %v290_v47 = vrot.slane %v289_v40, 2 }
  0x80   : > { %v263_v45 = vadd.f32 %v262_v42, %v261_v37  ;;  %v269_v46 = vrot.slane %v268_v43, 2 }
  0x81   : > { %v297_v50 = vrot.slane %v296_v44, 2  ;;  %v291_v53 = vadd.f32 %v290_v47, %v289_v40 }
  0x82   : > { %v264_v48 = vrot.slane %v263_v45, 1  ;;  %v270_v49 = vadd.f32 %v269_v46, %v268_v43 }
  0x83   : > { %v298_v55 = vadd.f32 %v297_v50, %v296_v44  ;;  %v292_v56 = vrot.slane %v291_v53, 1 }
  0x84   : > { %v265_v51 = vadd.f32 %v264_v48, %v263_v45  ;;  %v271_v52 = vrot.slane %v270_v49, 1 }
  0x85   : > { %v299_v57 = vrot.slane %v298_v55, 1  ;;  %v293_v60 = vadd.f32 %v292_v56, %v291_v53 }
  0x86   : > { %v272_v54 = vadd.f32 %v271_v52, %v270_v49  ;;  %546 = vrcp.f32 %v265_v51 }
  0x87   : > { %v300_v61 = vadd.f32 %v299_v57, %v298_v55 }
  0x88   : > { %548 = vrcp.f32 %v272_v54 }
  0x90   : > { %v547_v63 = vpop.eup %546 }
  0x91   : > { %v302_v0 = vmul.f32 %v547_v63, %v293_v60 }
  0x92   : > { %v549_v2 = vpop.eup %548 }
  0x93   : > { %v304_v3 = vmul.f32 %v549_v2, %v300_v61 }
  0x95   : > { %v308_v5 = vcombine.low %v302_v0, %v304_v3 }
  0x97   : > { %v315_v6 = vrot.slane %v308_v5, %v314_v4 }
  0x99   : > { %v322_v8 = vrot.slane %v315_v6, %v314_v4 }
  0x9b   : > { %v324_v9 = vadd.f32 %v322_v8, %v305_v7 }
  0x9d   : > { %329 = vst.msk [vmem:[%s886_s19] sm:$0x3] %vm882_vm0, %v324_v9 }
  0x9e   : > { %623 = shalt.err (!%p620_p2)
}
  0x9f   : > { %s624_s8 = scalar_lea.hbm %s904_s27, 32  ;;  %s628_s4 = scalar_lea.hbm %s958_s2, 64 }
  0xa0   : > { %p625_p9 = scmp.ne.s32.totalorder %s904_s27, %s624_s8  ;;  %p629_p6 = scmp.lt.u32.totalorder %s904_s27, %s958_s2 }
  0xa1   : > { %p630_p13 = scmp.lt.u32.totalorder %s628_s4, %s624_s8  ;;  %p632_p8 = scmp.lt.u32.totalorder %s624_s8, %s904_s27 }
  0xa2   : > { %p626_p11 = pnand %p625_p9, %p973_p0 }
  0xa3   : > { %p631_p5 = por %p630_p13, %p629_p6 }
  0xa4   : > { %p627_p3 = pneg %p626_p11 }
  0xa5   : > { %p633_p7 = por %p632_p8, %p631_p5 }
  0xa7   : > { %p634_p4 = pnand %p633_p7, %p627_p3 }
  0xa9   : > { %637 = shalt.err (!%p634_p4)
}
  0xaa   : > { %478 = dma.vmem_to_hbm [thread:$0]  (%p973_p0), %s906_s30, 32, %s904_s27, %s331_s28  }
  0xab PF: > { %s357_s29 = sand.u32 1, %s676_s9   ;;  %p974_p10 = scmp.ne.s32.totalorder %s964_s24, 0 }
  0xac   : > { %p975_p12 = scmp.ge.s32.totalorder %s696_s14, 2  ;;  %s358_s16 = scalar_lea.sflag [#allocation4], %s357_s29 }
  0xae   : > { %p488_p1 = pnand %p975_p12, %p974_p10 }
  0xb0   : > { %671 = dma.done.wait (!%p488_p1), %s358_s16, 32  }
  0xb1   : > { %673 = vsyncadd (!%p488_p1), %s358_s16, 4294967264  ;;  %s21_s14 = sadd.s32 1, %s696_s14   ;;  %s976_s9 = smov %s680_s10 }
  0xb2   : > { %p18_p2 = scmp.ge.s32.totalorder %s21_s14, 4   ;;  %s977_s10 = smov %s684_s11 }
  0xb3   : > { %s978_s11 = smov %s774_s23  ;;  %s979_s12 = smov %s692_s13 }
  0xb4   : > { %s980_s13 = smov %s982_s17  ;;  %20 = sbr.rel (!%p18_p2) target bundleno = 8 (0x8), region = 90 }
  0xbb   :  { %363 = vsyncpa [#allocation3], 1 }
  0xbc   :  { %365 = vsyncpa [#allocation3 + $0x1], 1 }
  0xbd   :  { %366 = vsyncpa [#allocation6], 1 }
  0xbe   :  { %368 = vsyncpa [#allocation6 + $0x1], 1 }
  0xbf   :  { %369 = vsyncpa [#allocation4], 1 }
  0xc0   :  { %371 = vsyncpa [#allocation4 + $0x1], 1 }

</bundles_post_ra>
